<compile_context>
chip_gen: v7x
topology: tpu7x:2x2x1
jax: 0.10.0
libtpu: 0.0.40
codegen_flags: <defaults>
</compile_context>

<pallas_src>
import functools
from types import SimpleNamespace

import numpy as np

import jax
import jax.numpy as jnp
from jax.experimental import pallas as pl
from jax.experimental.pallas import tpu as pltpu


# ---- config that the original torch module reads from a global `config` ----
config = SimpleNamespace(
    LOSS=SimpleNamespace(BALANCE_WEIGHTS=(0.4, 1.0), AUX_WEIGHTS=1.0)
)


# ----------------------------- Pallas kernel --------------------------------
def _ce_prob_kernel(ignore_index, hw, with_prob,
                    logits_ref, tgt_ref, loss_ref, prob_ref=None):
    """Per-pixel cross-entropy (reduction='none') and softmax prob of target.

    Classes on sublanes, pixels on lanes:
      logits_ref: (C, TP) native dtype, tgt_ref: (1, TP) i32
      loss_ref (and optionally prob_ref): (1, TP) f32
    All reductions are per-lane over the C sublanes, so nothing leaks across
    pixels; the ragged edge tile is additionally masked with a lane-index
    check against H*W (its stores past H*W are discarded by Pallas anyway).
    """
    logits = logits_ref[...].astype(jnp.float32)              # (C, TP)
    tgt = tgt_ref[...]                                         # (1, TP)
    tp = tgt.shape[1]

    # Lanes of the (possibly ragged) last tile that fall beyond H*W.
    lane = jax.lax.broadcasted_iota(jnp.int32, tgt.shape, 1)   # (1, TP)
    in_bounds = (pl.program_id(1) * tp + lane) < hw
    valid = (tgt != ignore_index) & in_bounds
    safe_tgt = jnp.where(valid, tgt, 0)

    # Stable log-softmax over the class (sublane) axis.
    m = jnp.max(logits, axis=0, keepdims=True)                 # (1, TP)
    z = logits - m                                             # (C, TP)
    lse = jnp.log(jnp.sum(jnp.exp(z), axis=0, keepdims=True))  # (1, TP)

    # z at the target class via a masked sublane reduction (no f32 one-hot
    # products).  Targets outside [0, C) behave like torch only for the
    # ignore_index; other out-of-range labels silently give loss = lse.
    cls = jax.lax.broadcasted_iota(jnp.int32, logits.shape, 0)
    z_t = jnp.sum(jnp.where(cls == safe_tgt, z, 0.0), axis=0, keepdims=True)

    # CE loss = lse - z_t ; CrossEntropyLoss(ignore_index, 'none') -> 0 there.
    loss = lse - z_t
    loss_ref[...] = jnp.where(valid, loss, 0.0)

    if with_prob:
        # softmax prob of the target class is exactly exp(-loss); invalid
        # pixels carry sentinel 2.0 (> any real probability) so they never
        # participate in the OHEM order statistic.
        prob_t = jnp.minimum(jnp.exp(-loss), 1.0)
        prob_ref[...] = jnp.where(valid, prob_t, 2.0)


# ------------------------------ tiling helpers -------------------------------
def _cdiv(a, b):
    return (a + b - 1) // b


def _pick_tile(C, HW, N, logits_itemsize, tp_max, vmem_budget_bytes):
    """Pixel-tile width: multiple of 128, sized from C against a VMEM budget."""
    # Per grid step: ~2x (double-buffered) logits blocks + a few f32 (C, TP)
    # intermediates (z, exp(z), class-mask) + small (1, TP) rows.
    bytes_per_pixel = 2 * C * logits_itemsize + 4 * C * 4 + 64
    tp = min(tp_max, vmem_budget_bytes // bytes_per_pixel)
    tp = max(128, (tp // 128) * 128)
    if HW >= 128:
        tp = min(tp, (HW // 128) * 128)      # keep the block <= the array
    # v7x megacore: keep enough grid steps to feed both TensorCores.
    while tp > 512 and N * _cdiv(HW, tp) < 8:
        tp = max(512, ((tp // 2 + 127) // 128) * 128)
    return tp


# ------------------------------ kernel wrapper --------------------------------
def per_pixel_ce_and_prob(pred_nchw, target_nhw, ignore_index, with_prob=True,
                          tp_max=32768, vmem_budget_bytes=24 * 1024 * 1024):
    """Per-pixel CE loss (and optionally target-class prob), shaped (N, H*W)."""
    N, C, H, W = pred_nchw.shape
    HW = H * W

    # Free reshapes of the NCHW tensors: no transpose, no pad, no dtype cast.
    x = pred_nchw.reshape(N, C, HW)
    t = target_nhw.reshape(N, 1, HW).astype(jnp.int32)

    TP = _pick_tile(C, HW, N, jnp.dtype(x.dtype).itemsize, tp_max,
                    vmem_budget_bytes)
    grid = (N, _cdiv(HW, TP))

    kernel = functools.partial(_ce_prob_kernel, ignore_index, HW, with_prob)
    out_block = pl.BlockSpec((None, 1, TP), lambda n, i: (n, 0, i))
    if with_prob:
        out_shape = (jax.ShapeDtypeStruct((N, 1, HW), jnp.float32),
                     jax.ShapeDtypeStruct((N, 1, HW), jnp.float32))
        out_specs = (out_block, pl.BlockSpec((None, 1, TP), lambda n, i: (n, 0, i)))
    else:
        out_shape = jax.ShapeDtypeStruct((N, 1, HW), jnp.float32)
        out_specs = out_block

    out = pl.pallas_call(
        kernel,
        out_shape=out_shape,
        grid=grid,
        in_specs=[pl.BlockSpec((None, C, TP), lambda n, i: (n, 0, i)),
                  pl.BlockSpec((None, 1, TP), lambda n, i: (n, 0, i))],
        out_specs=out_specs,
        compiler_params=pltpu.CompilerParams(
            dimension_semantics=("parallel", "parallel"),
            vmem_limit_bytes=48 * 1024 * 1024),
    )(x, t)

    if with_prob:
        loss, prob = out
        return loss.reshape(N, HW), prob.reshape(N, HW)
    return out.reshape(N, HW)


# --------------------- exact OHEM order statistic (no top_k) ------------------
def _f32_bits(x):
    return int(np.asarray(x, dtype=np.float32).view(np.int32))


def _kth_smallest_via_bitsearch(prob, k, threshold):
    """Exact k-th (0-indexed) smallest entry of `prob` among values <= 1.0.

    Only called when that value is known to lie in (threshold, 1.0]; the
    ignore sentinel 2.0 is excluded automatically.  Non-negative f32 values
    are monotone in their int32 bit pattern, so a binary search over bit
    patterns with one O(P) count per step finds the exact data value.
    """
    bits = jax.lax.bitcast_convert_type(prob, jnp.int32)
    lo0 = _f32_bits(threshold)
    hi0 = _f32_bits(1.0)
    n_iters = max(1, int(np.ceil(np.log2(max(hi0 - lo0, 2)))))

    def body(_, carry):
        lo, hi = carry
        mid = (lo + hi) // 2
        cnt = jnp.sum((bits <= mid).astype(jnp.int32))
        go_left = cnt >= k + 1                    # answer <= mid
        return (jnp.where(go_left, lo, mid), jnp.where(go_left, mid, hi))

    _, hi = jax.lax.fori_loop(0, n_iters, body,
                              (jnp.int32(lo0), jnp.int32(hi0)))
    return jax.lax.bitcast_convert_type(hi, jnp.float32)


# --------------------------- module equivalent -------------------------------
class OHEMCrossEntropyLoss:
    def __init__(self, ignore_index=-1, threshold=0.7, min_kept=100000, weight=None):
        # TODO(synk): per-class weights (weight != None) not implemented.
        assert weight is None
        self.threshold = float(threshold)
        self.min_kept = max(1, min_kept)
        self.ignore_index = ignore_index

    def _standard_loss(self, prediction, target):
        N, C, H, W = prediction.shape
        # prob output (and its gather/store traffic) skipped for aux heads.
        loss = per_pixel_ce_and_prob(prediction, target, self.ignore_index,
                                     with_prob=False)
        return loss.reshape(N, H, W)

    def _ohem_loss(self, prediction, target):
        loss2d, prob2d = per_pixel_ce_and_prob(prediction, target,
                                               self.ignore_index, with_prob=True)
        loss = loss2d.reshape(-1)
        prob = prob2d.reshape(-1)
        valid = target.reshape(-1) != self.ignore_index
        num_valid = jnp.sum(valid.astype(jnp.int32))

        k = jnp.maximum(jnp.minimum(jnp.int32(self.min_kept), num_valid - 1), 0)
        thr = jnp.float32(self.threshold)

        # torch: thresh = max(kth_smallest_valid_prob, threshold).  The order
        # statistic only matters when it exceeds `threshold`, i.e. when fewer
        # than k+1 valid pixels have prob <= threshold (ignored pixels carry
        # sentinel 2.0 so a plain count works).
        c_le = jnp.sum((prob <= thr).astype(jnp.int32))
        min_value = jax.lax.cond(
            c_le > k,
            lambda: thr,
            lambda: _kth_smallest_via_bitsearch(prob, k, self.threshold),
        )
        thresh = jnp.maximum(min_value, thr)

        # kept set {valid & prob < thresh} is identical to torch's
        # pixel_losses[valid][indices][prob_sorted < thresh]
        kept = (valid & (prob < thresh)).astype(jnp.float32)
        # NaN if kept is empty, matching torch .mean() on an empty tensor.
        return jnp.sum(loss * kept) / jnp.sum(kept)

    def forward(self, predictions, target):
        if not isinstance(predictions, (list, tuple)):
            predictions = [predictions]
        balance_weights = config.LOSS.BALANCE_WEIGHTS
        aux_weights = config.LOSS.AUX_WEIGHTS
        if len(balance_weights) == len(predictions):
            loss_fns = [self._standard_loss] * (len(balance_weights) - 1) + [self._ohem_loss]
            return sum(w * fn(pred, target)
                       for w, pred, fn in zip(balance_weights, predictions, loss_fns))
        elif len(predictions) == 1:
            return aux_weights * self._ohem_loss(predictions[0], target)
        else:
            raise ValueError("Mismatch between number of predictions and balance weights.")

    __call__ = forward


# --------------------------------- demo --------------------------------------
if __name__ == "__main__":
    key = jax.random.PRNGKey(0)
    k1, k2, k3, k4, k5 = jax.random.split(key, 5)

    N, C, H, W = 2, 4, 16, 16
    logits = jax.random.normal(k1, (N, C, H, W), dtype=jnp.float32)
    target = jax.random.randint(k2, (N, H, W), 0, C, dtype=jnp.int32)
    ignore_mask = jax.random.bernoulli(k3, 0.1, (N, H, W))
    target = jnp.where(ignore_mask, -1, target)

    # ---------------- pure-JAX references (small shapes only) ----------------
    def ref_per_pixel(pred, tgt, ignore_index):
        n, c, h, w = pred.shape
        x = pred.astype(jnp.float32).reshape(n, c, h * w).transpose(0, 2, 1)
        t = tgt.reshape(n, h * w)
        valid = t != ignore_index
        tt = jnp.where(valid, t, 0)
        logp = jax.nn.log_softmax(x, axis=-1)
        loss = -jnp.take_along_axis(logp, tt[..., None], axis=-1)[..., 0]
        prob = jnp.take_along_axis(jax.nn.softmax(x, axis=-1),
                                   tt[..., None], axis=-1)[..., 0]
        return jnp.where(valid, loss, 0.0), jnp.where(valid, prob, 2.0), valid

    def ref_ohem(pred, tgt, ignore_index, threshold, min_kept):
        loss, prob, valid = ref_per_pixel(pred, tgt, ignore_index)
        loss, prob, valid = loss.reshape(-1), prob.reshape(-1), valid.reshape(-1)
        num_valid = jnp.sum(valid.astype(jnp.int32))
        sorted_prob = jnp.sort(prob)              # invalid (2.0) sort last
        k = jnp.maximum(jnp.minimum(min_kept, num_valid - 1), 0)
        min_value = sorted_prob[k]
        thresh = jnp.maximum(min_value, jnp.float32(threshold))
        kept = valid & (prob < thresh)
        return jnp.sum(jnp.where(kept, loss, 0.0)) / jnp.sum(kept)

    # --- per-pixel kernel vs reference (f32) ---
    loss_k, prob_k = per_pixel_ce_and_prob(logits, target, -1, with_prob=True)
    loss_r, prob_r, _ = ref_per_pixel(logits, target, -1)
    assert jnp.allclose(loss_k, loss_r, atol=1e-5, rtol=1e-5)
    assert jnp.allclose(prob_k, prob_r, atol=1e-5, rtol=1e-5)

    # --- bf16 logits pass straight through (no wrapper cast) ---
    loss_kb, prob_kb = per_pixel_ce_and_prob(logits.astype(jnp.bfloat16), target,
                                             -1, with_prob=True)
    loss_rb, prob_rb, _ = ref_per_pixel(logits.astype(jnp.bfloat16), target, -1)
    assert jnp.allclose(loss_kb, loss_rb, atol=1e-5, rtol=1e-5)
    assert jnp.allclose(prob_kb, prob_rb, atol=1e-5, rtol=1e-5)

    # --- ragged last tile (HW not a multiple of TP), loss-only path ---
    H2, W2, C2 = 20, 20, 5                      # HW = 400, TP forced to 256
    logits_rg = jax.random.normal(k4, (1, C2, H2, W2), dtype=jnp.float32)
    target_rg = jax.random.randint(k5, (1, H2, W2), 0, C2, dtype=jnp.int32)
    loss_krg = per_pixel_ce_and_prob(logits_rg, target_rg, -1,
                                     with_prob=False, tp_max=256)
    loss_rrg, _, _ = ref_per_pixel(logits_rg, target_rg, -1)
    assert jnp.allclose(loss_krg, loss_rrg, atol=1e-5, rtol=1e-5)

    # --- OHEM, single prediction: min_kept=100000 > P exercises the exact
    #     bit-pattern binary search (k-th order statistic > threshold) ---
    loss_default = OHEMCrossEntropyLoss(ignore_index=-1, threshold=0.7,
                                        min_kept=100000)
    out = jax.block_until_ready(loss_default(logits, target))
    ref = ref_ohem(logits, target, -1, 0.7, 100000)
    assert out.shape == () and bool(jnp.isfinite(out))
    assert jnp.allclose(out, ref, rtol=1e-3, atol=1e-6)

    # --- OHEM, small min_kept exercises the threshold-dominates fast path ---
    loss_small = OHEMCrossEntropyLoss(ignore_index=-1, threshold=0.7,
                                      min_kept=100)
    out_a = jax.block_until_ready(loss_small(logits, target))
    ref_a = ref_ohem(logits, target, -1, 0.7, 100)
    assert out_a.shape == () and bool(jnp.isfinite(out_a))
    assert jnp.allclose(out_a, ref_a, rtol=1e-3, atol=1e-6)

    # --- two-prediction path: 0.4 * standard (N,H,W) + 1.0 * ohem (scalar) ---
    out2 = jax.block_until_ready(loss_small([logits, logits], target))
    ref2 = 0.4 * loss_r.reshape(N, H, W) + 1.0 * ref_a
    assert out2.shape == (N, H, W) and bool(jnp.all(jnp.isfinite(out2)))
    assert jnp.allclose(out2, ref2, rtol=1e-3, atol=1e-5)

    print("KERNEL_OK")
</pallas_src>

<mosaic_0001>
module attributes {stable_mosaic.version = 11 : i64} {
  func.func @_ce_prob_kernel(%arg0: i32, %arg1: i32, %arg2: memref<1x4x256xf32, #tpu.memory_space<vmem>>, %arg3: memref<1x1x256xi32, #tpu.memory_space<vmem>>, %arg4: memref<1x1x256xf32, #tpu.memory_space<vmem>>, %arg5: memref<1x1x256xf32, #tpu.memory_space<vmem>>) attributes {dimension_semantics = [#tpu.dimension_semantics<parallel>, #tpu.dimension_semantics<parallel>], iteration_bounds = array<i64: 2, 1>, scalar_prefetch = 0 : i64, scratch_operands = 0 : i64, tpu.core_type = #tpu.core_type<tc>, window_params = [{transform_indices = @transform_0, window_bounds = array<i64: 1, 4, 256>}, {transform_indices = @transform_1, window_bounds = array<i64: 1, 1, 256>}, {transform_indices = @transform_2, window_bounds = array<i64: 1, 1, 256>}, {transform_indices = @transform_3, window_bounds = array<i64: 1, 1, 256>}]} {
    %c0 = arith.constant 0 : index
    %c0_0 = arith.constant 0 : index
    %c0_1 = arith.constant 0 : index
    %0 = vector.load %arg2[%c0, %c0_0, %c0_1] : memref<1x4x256xf32, #tpu.memory_space<vmem>>, vector<1x4x256xf32>
    %1 = vector.shape_cast %0 : vector<1x4x256xf32> to vector<4x256xf32>
    %c0_2 = arith.constant 0 : index
    %c0_3 = arith.constant 0 : index
    %c0_4 = arith.constant 0 : index
    %2 = vector.load %arg3[%c0_2, %c0_3, %c0_4] : memref<1x1x256xi32, #tpu.memory_space<vmem>>, vector<1x1x256xi32>
    %3 = vector.shape_cast %2 : vector<1x1x256xi32> to vector<1x256xi32>
    %4 = tpu.iota {dimensions = array<i32: 1>} : vector<1x256xi32>
    %c256_i32 = arith.constant 256 : i32
    %5 = arith.muli %arg1, %c256_i32 : i32
    %6 = vector.broadcast %5 : i32 to vector<1x256xi32>
    %7 = arith.addi %6, %4 : vector<1x256xi32>
    %c256_i32_5 = arith.constant 256 : i32
    %8 = vector.broadcast %c256_i32_5 : i32 to vector<1x256xi32>
    %9 = arith.cmpi slt, %7, %8 : vector<1x256xi32>
    %c-1_i32 = arith.constant -1 : i32
    %10 = vector.broadcast %c-1_i32 : i32 to vector<1x256xi32>
    %11 = arith.cmpi ne, %3, %10 : vector<1x256xi32>
    %12 = arith.andi %11, %9 : vector<1x256xi1>
    %c0_i32 = arith.constant 0 : i32
    %13 = vector.broadcast %c0_i32 : i32 to vector<1x256xi32>
    %14 = arith.select %12, %3, %13 : vector<1x256xi1>, vector<1x256xi32>
    %cst = arith.constant dense<0xFF800000> : vector<256xf32>
    %15 = vector.multi_reduction <maximumf>, %1, %cst [0] : vector<4x256xf32> to vector<256xf32>
    %16 = vector.shape_cast %15 : vector<256xf32> to vector<1x256xf32>
    %17 = vector.broadcast %16 : vector<1x256xf32> to vector<4x256xf32>
    %18 = arith.subf %1, %17 : vector<4x256xf32>
    %19 = math.exp %18 : vector<4x256xf32>
    %cst_6 = arith.constant dense<0.000000e+00> : vector<256xf32>
    %20 = vector.multi_reduction <add>, %19, %cst_6 [0] : vector<4x256xf32> to vector<256xf32>
    %21 = vector.shape_cast %20 : vector<256xf32> to vector<1x256xf32>
    %22 = math.log %21 : vector<1x256xf32>
    %23 = tpu.iota {dimensions = array<i32: 0>} : vector<4x256xi32>
    %24 = vector.broadcast %14 : vector<1x256xi32> to vector<4x256xi32>
    %25 = arith.cmpi eq, %23, %24 : vector<4x256xi32>
    %cst_7 = arith.constant 0.000000e+00 : f32
    %26 = vector.broadcast %cst_7 : f32 to vector<4x256xf32>
    %27 = arith.select %25, %18, %26 : vector<4x256xi1>, vector<4x256xf32>
    %cst_8 = arith.constant dense<0.000000e+00> : vector<256xf32>
    %28 = vector.multi_reduction <add>, %27, %cst_8 [0] : vector<4x256xf32> to vector<256xf32>
    %29 = vector.shape_cast %28 : vector<256xf32> to vector<1x256xf32>
    %30 = arith.subf %22, %29 : vector<1x256xf32>
    %cst_9 = arith.constant 0.000000e+00 : f32
    %31 = vector.broadcast %cst_9 : f32 to vector<1x256xf32>
    %32 = arith.select %12, %30, %31 : vector<1x256xi1>, vector<1x256xf32>
    %c0_10 = arith.constant 0 : index
    %c0_11 = arith.constant 0 : index
    %c0_12 = arith.constant 0 : index
    %33 = vector.load %arg4[%c0_10, %c0_11, %c0_12] : memref<1x1x256xf32, #tpu.memory_space<vmem>>, vector<1x1x256xf32>
    %34 = vector.shape_cast %33 : vector<1x1x256xf32> to vector<1x256xf32>
    %35 = vector.shape_cast %32 : vector<1x256xf32> to vector<1x1x256xf32>
    tpu.vector_store %arg4[%c0_10, %c0_11, %c0_12], %35 {strides = array<i32>} : memref<1x1x256xf32, #tpu.memory_space<vmem>>, vector<1x1x256xf32>,
    %cst_13 = arith.constant 0.000000e+00 : f32
    %36 = vector.broadcast %cst_13 : f32 to vector<1x256xf32>
    %37 = arith.subf %36, %30 : vector<1x256xf32>
    %38 = math.exp %37 : vector<1x256xf32>
    %cst_14 = arith.constant 1.000000e+00 : f32
    %39 = vector.broadcast %cst_14 : f32 to vector<1x256xf32>
    %40 = arith.minimumf %38, %39 : vector<1x256xf32>
    %cst_15 = arith.constant 2.000000e+00 : f32
    %41 = vector.broadcast %cst_15 : f32 to vector<1x256xf32>
    %42 = arith.select %12, %40, %41 : vector<1x256xi1>, vector<1x256xf32>
    %c0_16 = arith.constant 0 : index
    %c0_17 = arith.constant 0 : index
    %c0_18 = arith.constant 0 : index
    %43 = vector.load %arg5[%c0_16, %c0_17, %c0_18] : memref<1x1x256xf32, #tpu.memory_space<vmem>>, vector<1x1x256xf32>
    %44 = vector.shape_cast %43 : vector<1x1x256xf32> to vector<1x256xf32>
    %45 = vector.shape_cast %42 : vector<1x256xf32> to vector<1x1x256xf32>
    tpu.vector_store %arg5[%c0_16, %c0_17, %c0_18], %45 {strides = array<i32>} : memref<1x1x256xf32, #tpu.memory_space<vmem>>, vector<1x1x256xf32>,
    return
  }
  func.func @transform_0(%arg0: i32, %arg1: i32) -> (i32, i32, i32) {
    %c0_i32 = arith.constant 0 : i32
    %c0_i32_0 = arith.constant 0 : i32
    return %arg0, %c0_i32, %arg1 : i32, i32, i32
  }
  func.func @transform_1(%arg0: i32, %arg1: i32) -> (i32, i32, i32) {
    %c0_i32 = arith.constant 0 : i32
    %c0_i32_0 = arith.constant 0 : i32
    return %arg0, %c0_i32, %arg1 : i32, i32, i32
  }
  func.func @transform_2(%arg0: i32, %arg1: i32) -> (i32, i32, i32) {
    %c0_i32 = arith.constant 0 : i32
    %c0_i32_0 = arith.constant 0 : i32
    return %arg0, %c0_i32, %arg1 : i32, i32, i32
  }
  func.func @transform_3(%arg0: i32, %arg1: i32) -> (i32, i32, i32) {
    %c0_i32 = arith.constant 0 : i32
    %c0_i32_0 = arith.constant 0 : i32
    return %arg0, %c0_i32, %arg1 : i32, i32, i32
  }
}

</mosaic_0001>

<bundles_post_ra>
// kernel: tpu_custom_call.1
= control target key start
LH: loop header
LB: loop body
LE: loop exit
PB: predicated region body
PF: predicated region fallthrough
CT: control target
= control target key end

     0   :  { %9 = vsyncpa [#allocation3], 0  ;;  %s1215_s0 = inlined_call_operand.hbm [shape: f32[2,4,256], index: 0, kind: input, shape index: {}]   ;;  %s1216_s1 = inlined_call_operand.hbm [shape: s32[2,1,256], index: 1, kind: input, shape index: {}]   ;;  %s1217_s2 = inlined_call_operand.hbm [shape: f32[2,1,256], index: 2, kind: output, shape index: {0}]   ;;  %s1218_s3 = inlined_call_operand.hbm [shape: f32[2,1,256], index: 3, kind: output, shape index: {1}]  }
   0x1   :  { %11 = vsyncpa [#allocation3 + $0x1], 0 }
   0x2   :  { %12 = vsyncpa [#allocation6], 0 }
   0x3   :  { %14 = vsyncpa [#allocation6 + $0x1], 0 }
   0x4   :  { %15 = vsyncpa [#allocation4], 0 }
   0x5   :  { %17 = vsyncpa [#allocation4 + $0x1], 0 }
   0x6   :  { %18 = vsyncpa [#allocation9], 0 }
   0x7   :  { %20 = vsyncpa [#allocation9 + $0x1], 0  ;;  %s928_s12 = smov 0   ;;  %s930_s13 = smov 0  }
   0x8   :  { %s932_s14 = smov 0   ;;  %s934_s15 = smov 0  }
   0x9   :  { %s936_s16 = smov 0   ;;  %s938_s17 = smov 0  }
   0xa LB: > { %s610_s18 = sadd.s32 4294967295, %s900_s17   ;;  %s611_s19 = sadd.s32 4294967294, %s900_s17   ;;  %s900_s17 = sphi %s938_s17, %s26_s17   ;;  %s896_s16 = sphi %s936_s16, %s1242_s16   ;;  %s892_s15 = sphi %s934_s15, %s1241_s15   ;;  %s888_s14 = sphi %s932_s14, %s1240_s14   ;;  %s884_s13 = sphi %s930_s13, %s1239_s13   ;;  %s880_s12 = sphi %s928_s12, %s1238_s12  }
   0xb   : > { %s38_s20 = sadd.s32 1, %s896_s16  ;;  %s47_s21 = sadd.s32 1, %s888_s14 }
   0xc   : > { %p40_p0 = scmp.ge.s32.totalorder %s38_s20, 2  ;;  %p54_p1 = scmp.ne.s32.totalorder %s888_s14, %s884_s13 }
   0xd   : > { %p55_p2 = scmp.eq.s32.totalorder %s900_s17, 0  ;;  %p60_p3 = scmp.ne.s32.totalorder %s884_s13, %s880_s12 }
   0xe   : > { %s1244_s20 = smov (%p40_p0, %s38_s20), 0  ;;  %p61_p5 = scmp.eq.s32.totalorder %s610_s18, 0 }
   0xf   : > { %p969_p4 = por %p55_p2, %p54_p1  ;;  %s42_s23 = ssub.s32 %s896_s16, %s1244_s20 }
  0x10   : > { %p114_p6 = scmp.eq.s32.totalorder %s610_s18, 1  ;;  %p45_p7 = scmp.eq.s32.totalorder %s42_s23, 0 }
  0x11   : > { %p975_p8 = por %p61_p5, %p60_p3  ;;  %p120_p10 = scmp.eq.s32.totalorder %s611_s19, 1 }
  0x12   : > { %p979_p9 = por %p114_p6, %p54_p1  ;;  %p659_p13 = scmp.lt.s32.totalorder %s900_s17, 2 }
  0x13   : > { %s1222_s24 = scalar_select %p975_p8, 1, 0 }
  0x14   : > { %s1223_s25 = scalar_select %p979_p9, 1, 0 }
  0x15   : > { %s984_s26 = scalar_select %p45_p7, %s888_s14, %s47_s21  }
  0x16   : > { %p986_p11 = por %p120_p10, %p60_p3  ;;  %s993_s28 = sand.u32 1, %s888_s14  }
  0x17   : > { %s614_s29 = sshll.u32 %s993_s28, 3  ;;  %s633_s30 = sshll.u32 %s896_s16, 7 }
  0x18   : > { %s1224_s27 = scalar_select %p986_p11, 1, 0 }
  0x19   : > { %s1000_s6 = scalar_lea.hbm %s1215_s0, %s633_s30  ;;  %s172_s7 = scalar_lea.vmem [#allocation2], %s614_s29 }
  0x1a   : > { %s182_s8 = sshll.u32 %s172_s7, 4  ;;  %p1006_p0 = pnand %p659_p13, %p969_p4  ;;  %s1002_s8 = int_to_ptr.vmem [resolvable:$true] %s182_s8 }
  0x1b   : > { %s169_s10 = scalar_lea.sflag [#allocation3], %s993_s28  ;;  %s722_s11 = scalar_lea.hbm %s1000_s6, 128 }
  0x1c   : > { %p723_p3 = scmp.ne.s32.totalorder %s1000_s6, %s722_s11  ;;  %p724_p5 = pneg %p1006_p0 }
  0x1d   : > { %s727_s21 = scalar_lea.hbm %s1215_s0, 256  ;;  %p728_p4 = scmp.lt.u32.totalorder %s1000_s6, %s1215_s0 }
  0x1e   : > { %p725_p6 = pnand %p724_p5, %p723_p3  ;;  %p729_p10 = scmp.lt.u32.totalorder %s727_s21, %s722_s11 }
  0x1f   : > { %p731_p12 = scmp.lt.u32.totalorder %s722_s11, %s1000_s6 }
  0x20   : > { %p726_p7 = pneg %p725_p6  ;;  %p730_p13 = por %p729_p10, %p728_p4 }
  0x22   : > { %p732_p1 = por %p731_p12, %p730_p13 }
  0x24   : > { %p733_p2 = pnand %p732_p1, %p726_p7 }
  0x26   : > { %736 = shalt.err (!%p733_p2)
}
  0x27   : > { %s737_s29 = scalar_lea.vmem %s1002_s8, 128  ;;  %s902_s30 = smov [#allocation2]  }
  0x28   : > { %p738_p3 = scmp.ne.s32.totalorder %s1002_s8, %s737_s29  ;;  %s742_s4 = sshll.u32 %s902_s30, 4  ;;  %s743_s4 = int_to_ptr.vmem [resolvable:$false] %s742_s4 }
  0x29   : > { %s744_s5 = scalar_lea.vmem %s743_s4, 256  ;;  %p745_p9 = scmp.lt.s32.totalorder %s1002_s8, %s743_s4 }
  0x2a   : > { %p740_p6 = pnand %p738_p3, %p724_p5  ;;  %p746_p4 = scmp.lt.s32.totalorder %s744_s5, %s737_s29 }
  0x2c   : > { %p741_p11 = pneg %p740_p6  ;;  %p747_p10 = por %p746_p4, %p745_p9 }
  0x2e   : > { %p748_p12 = pnand %p747_p10, %p741_p11 }
  0x30   : > { %751 = shalt.err (!%p748_p12)
}
  0x31   : > { %648 = dma.hbm_to_vmem [thread:$0]  (!%p1006_p0), %s1000_s6, 128, %s1002_s8, %s169_s10  }
  0x32   : > { %p1226_p1 = scmp.lt.s32.totalorder %s900_s17, 3  ;;  %p1227_p2 = scmp.ge.s32.totalorder %s900_s17, 1 }
  0x33   : > { %s617_s11 = sshll.u32 %s993_s28, 1  ;;  %s634_s18 = sshll.u32 %s896_s16, 5 }
  0x34   : > { %p1042_p7 = pnand %p1227_p2, %p1226_p1  ;;  %s1051_s22 = scalar_lea.hbm %s1216_s1, %s634_s18 }
  0x35   : > { %s193_s23 = scalar_lea.vmem [#allocation5], %s617_s11  ;;  %s190_s6 = scalar_lea.sflag [#allocation6], %s993_s28 }
  0x36   : > { %s1228_s7 = scalar_select %p1042_p7, 1, 0 }
  0x37   : > { %s203_s29 = sshll.u32 %s193_s23, 4  ;;  %s752_s8 = scalar_lea.hbm %s1051_s22, 32  ;;  %s204_s29 = int_to_ptr.vmem [resolvable:$true] %s203_s29 }
  0x38   : > { %p753_p9 = scmp.ne.s32.totalorder %s1051_s22, %s752_s8  ;;  %s757_s4 = scalar_lea.hbm %s1216_s1, 64 }
  0x39   : > { %p758_p3 = scmp.lt.u32.totalorder %s1051_s22, %s1216_s1  ;;  %p759_p6 = scmp.lt.u32.totalorder %s757_s4, %s752_s8 }
  0x3a   : > { %p755_p11 = pnand %p753_p9, %p724_p5  ;;  %p761_p10 = scmp.lt.u32.totalorder %s752_s8, %s1051_s22 }
  0x3b   : > { %p760_p4 = por %p759_p6, %p758_p3 }
  0x3c   : > { %p756_p13 = pneg %p755_p11 }
  0x3d   : > { %p762_p12 = por %p761_p10, %p760_p4 }
  0x3f   : > { %p763_p1 = pnand %p762_p12, %p756_p13 }
  0x41   : > { %766 = shalt.err (!%p763_p1)
}
  0x42   : > { %s767_s28 = scalar_lea.vmem %s204_s29, 32  ;;  %s903_s11 = smov [#allocation5]  }
  0x43   : > { %p768_p2 = scmp.ne.s32.totalorder %s204_s29, %s767_s28  ;;  %s772_s19 = sshll.u32 %s903_s11, 4  ;;  %s773_s19 = int_to_ptr.vmem [resolvable:$false] %s772_s19 }
  0x44   : > { %s774_s21 = scalar_lea.vmem %s773_s19, 64  ;;  %p775_p8 = scmp.lt.s32.totalorder %s204_s29, %s773_s19 }
  0x45   : > { %p770_p9 = pnand %p768_p2, %p724_p5  ;;  %p776_p7 = scmp.lt.s32.totalorder %s774_s21, %s767_s28 }
  0x47   : > { %p771_p11 = pneg %p770_p9  ;;  %p777_p3 = por %p776_p7, %p775_p8 }
  0x49   : > { %p778_p6 = pnand %p777_p3, %p771_p11 }
  0x4b   : > { %781 = shalt.err (!%p778_p6)
}
  0x4c   : > { %651 = dma.hbm_to_vmem [thread:$0]  (!%p1006_p0), %s1051_s22, 32, %s204_s29, %s190_s6  }
  0x4d   : > { %p1229_p13 = scmp.ne.s32.totalorder %s1228_s7, 0 }
  0x4e   : > { %s1076_s23 = sand.u32 (!%p1229_p13), 1, %s884_s13   ;;  %p1230_p5 = scmp.ne.s32.totalorder (!%p1229_p13), %s1222_s24, 0 }
  0x4f   : > { %212 = sbr.rel (%p1229_p13) target bundleno = 198 (0xc6), region = 28  ;;  %s621_s8 = sshll.u32 (!%p1229_p13), %s1076_s23, 3 }
  0x50   : > { %s215_s10 = scalar_lea.sflag (!%p1229_p13), [#allocation3], %s1076_s23  ;;  %s218_s30 = scalar_lea.vmem (!%p1229_p13), [#allocation2], %s621_s8 }
  0x56   : > { %863 = dma.done.wait (%p1230_p5), %s215_s10, 128  }
  0x57   : > { %865 = vsyncadd (%p1230_p5), %s215_s10, 4294967168  ;;  %s1085_s9 = sshll.u32 %s1076_s23, 1  ;;  %s224_s7 = scalar_lea.sflag [#allocation6], %s1076_s23 }
  0x58   : > { %s227_s22 = scalar_lea.vmem [#allocation5], %s1085_s9 }
  0x59   : > { %867 = dma.done.wait (%p1230_p5), %s224_s7, 32  }
  0x5a   : > { %869 = vsyncadd (%p1230_p5), %s224_s7, 4294967264  ;;  %v282_v0 = vlaneseq  ;;  %v904_v1 = vmov 1966171168   ;;  %vm299_vm0 = vcmask 1043456   ;;  %v264_v5 = vld [vmem:[%s218_s30] sm:$0xff]  ;;  %v905_v6 = vmov 1  }
  0x5b   : > { %v280_v2 = vunpack.c.l.s4 %v904_v1  ;;  %v278_v7 = vcombine.low %v905_v6, %v905_v6  ;;  %v297_v9 = vcombine.high %v264_v5, %v264_v5  ;;  %v300_v10 = vsel %vm299_vm0, %v264_v5, -inf  ;;  %v265_v21 = vld [vmem:[%s227_s22] sm:$0x3]  ;;  %s252_s24 = scalar_lea.vmem [#allocation7], %s1085_s9  ;;  %s635_s6 = sshll.u32 %s892_s15, 5 }
  0x5c   : > { %v283_v4 = vshrl.u32 %v282_v0, 7  ;;  %v301_v11 = vrot.slane %v300_v10, 4  ;;  %vm275_vm1 = vcmp.ne.s32.totalorder %v265_v21, 4294967295  ;;  %s449_s29 = sshll.u32 %s252_s24, 4  ;;  %vm1115_vm6 = vcmp.lt.s32.totalorder %v282_v0, 256  ;;  %s1126_s18 = scalar_lea.hbm %s1217_s2, %s635_s6  ;;  %s1119_s29 = int_to_ptr.vmem [resolvable:$true] %s449_s29 }
  0x5d   : > { %v281_v3 = vunpack.c.0.s8 %v280_v2  ;;  %v307_v12 = vsel %vm299_vm0, %v297_v9, -inf  ;;  %s428_s28 = scalar_lea.sflag [#allocation4], %s1076_s23  ;;  %s782_s11 = scalar_lea.vmem %s1119_s29, 32 }
  0x5e   : > { %v302_v13 = vmax.f32 %v300_v10, %v301_v11  ;;  %v308_v14 = vrot.slane %v307_v12, 4  ;;  %v346_v30 = vsub.s32 0, %v283_v4  ;;  %v350_v33 = vsub.s32 1, %v283_v4  ;;  %p783_p8 = scmp.ne.s32.totalorder %s1119_s29, %s782_s11  ;;  %p1235_p0 = scmp.ne.s32.totalorder %s1223_s25, 0 }
  0x5f   : > { %v1094_v8 = vsub.s32 %v281_v3, %v283_v4  ;;  %s906_s19 = smov [#allocation7]  }
  0x60   : > { %v303_v16 = vrot.slane %v302_v13, 2  ;;  %v309_v17 = vmax.f32 %v307_v12, %v308_v14  ;;  %p784_p7 = pnand %p783_p8, %p1235_p0  ;;  %s786_s21 = sshll.u32 %s906_s19, 4  ;;  %s787_s21 = int_to_ptr.vmem [resolvable:$false] %s786_s21 }
  0x61   : > { %v285_v15 = vrot.slane %v278_v7, %v1094_v8  ;;  %s788_s8 = scalar_lea.vmem %s787_s21, 64  ;;  %p789_p10 = scmp.lt.s32.totalorder %s1119_s29, %s787_s21 }
  0x62   : > { %v304_v18 = vmax.f32 %v302_v13, %v303_v16  ;;  %v310_v19 = vrot.slane %v309_v17, 2  ;;  %p785_p4 = pneg %p784_p7  ;;  %p790_p12 = scmp.lt.s32.totalorder %s788_s8, %s782_s11 }
  0x63   : > { %v292_v20 = vrot.slane %v285_v15, %v1094_v8 }
  0x64   : > { %v305_v22 = vrot.slane %v304_v18, 1  ;;  %v311_v23 = vmax.f32 %v309_v17, %v310_v19  ;;  %p791_p1 = por %p790_p12, %p789_p10 }
  0x65   : > { %vm293_vm2 = vcmp.ne.s32.totalorder %v292_v20, 0 }
  0x66   : > { %v306_v24 = vmax.f32 %v304_v18, %v305_v22  ;;  %v312_v25 = vrot.slane %v311_v23, 1  ;;  %vm1100_vm3 = vmand %vm275_vm1, %vm293_vm2  ;;  %p792_p2 = pnand %p791_p1, %p785_p4 }
  0x67   : > { %v295_v31 = vsel %vm1100_vm3, %v265_v21, 0 }
  0x68   : > { %v313_v26 = vmax.f32 %v311_v23, %v312_v25  ;;  %v347_v34 = vrot.slane %v295_v31, %v346_v30  ;;  %v351_v35 = vrot.slane %v295_v31, %v350_v33 }
  0x6a   : > { %v316_v28 = vcombine.low %v306_v24, %v313_v26  ;;  %vm352_vm4 = vcmp.eq.s32.totalorder %v283_v4, %v347_v34  ;;  %vm353_vm5 = vcmp.eq.s32.totalorder %v283_v4, %v351_v35 }
  0x6c   : > { %v318_v29 = vsub.f32 %v264_v5, %v316_v28 }
  0x6e   : > { %v319_v32 = vmul.f32 1.442695, %v318_v29  ;;  %v355_v36 = vcombine.high %v318_v29, %v318_v29  ;;  %v357_v37 = vsel %vm352_vm4, %v318_v29, 0.0 }
  0x6f   : > { %v359_v40 = vsel %vm299_vm0, %v357_v37, 0.0 }
  0x70   : > { %712 = vpow2.f32 %v319_v32  ;;  %v358_v38 = vsel %vm353_vm5, %v355_v36, 0.0  ;;  %v360_v46 = vrot.slane %v359_v40, 4 }
  0x71   : > { %v366_v44 = vsel %vm299_vm0, %v358_v38, 0.0 }
  0x72   : > { %v367_v49 = vrot.slane %v366_v44, 4  ;;  %v361_v52 = vadd.f32 %v360_v46, %v359_v40 }
  0x74   : > { %v368_v55 = vadd.f32 %v367_v49, %v366_v44  ;;  %v362_v58 = vrot.slane %v361_v52, 2 }
  0x76   : > { %v369_v61 = vrot.slane %v368_v55, 2  ;;  %v363_v63 = vadd.f32 %v362_v58, %v361_v52 }
  0x78   : > { %v370_v1 = vadd.f32 %v369_v61, %v368_v55  ;;  %v364_v2 = vrot.slane %v363_v63, 1 }
  0x7a   : > { %v713_v39 = vpop.eup %712  ;;  %v371_v3 = vrot.slane %v370_v1, 1  ;;  %v365_v4 = vadd.f32 %v364_v2, %v363_v63 }
  0x7b   : > { %v322_v41 = vcombine.high %v713_v39, %v713_v39  ;;  %v324_v42 = vsel %vm299_vm0, %v713_v39, 0.0 }
  0x7c   : > { %v325_v43 = vrot.slane %v324_v42, 4  ;;  %v372_v7 = vadd.f32 %v371_v3, %v370_v1 }
  0x7d   : > { %v331_v45 = vsel %vm299_vm0, %v322_v41, 0.0 }
  0x7e   : > { %v326_v47 = vadd.f32 %v325_v43, %v324_v42  ;;  %v332_v48 = vrot.slane %v331_v45, 4 }
  0x80   : > { %v327_v50 = vrot.slane %v326_v47, 2  ;;  %v333_v51 = vadd.f32 %v332_v48, %v331_v45 }
  0x82   : > { %v328_v53 = vadd.f32 %v327_v50, %v326_v47  ;;  %v334_v54 = vrot.slane %v333_v51, 2 }
  0x84   : > { %v329_v56 = vrot.slane %v328_v53, 1  ;;  %v335_v57 = vadd.f32 %v334_v54, %v333_v51 }
  0x86   : > { %v330_v59 = vadd.f32 %v329_v56, %v328_v53  ;;  %v336_v60 = vrot.slane %v335_v57, 1 }
  0x88   : > { %v337_v62 = vadd.f32 %v336_v60, %v335_v57  ;;  %714 = vlog2.f32 %v330_v59 }
  0x8a   : > { %716 = vlog2.f32 %v337_v62 }
  0x92   : > { %v715_v5 = vpop.eup %714 }
  0x93   : > { %v339_v6 = vmul.f32 0.6931472, %v715_v5 }
  0x94   : > { %v717_v9 = vpop.eup %716 }
  0x95   : > { %v341_v10 = vmul.f32 0.6931472, %v717_v9  ;;  %v373_v11 = vsub.f32 %v339_v6, %v365_v4 }
  0x97   : > { %v374_v12 = vsub.f32 %v341_v10, %v372_v7  ;;  %v399_v13 = vsub.f32 0.0, %v373_v11 }
  0x99   : > { %v377_v14 = vcombine.low %v373_v11, %v374_v12  ;;  %v400_v15 = vsub.f32 0.0, %v374_v12  ;;  %v401_v16 = vmul.f32 1.442695, %v399_v13 }
  0x9b   : > { %v384_v17 = vrot.slane %v377_v14, %v1094_v8  ;;  %v403_v18 = vmul.f32 1.442695, %v400_v15  ;;  %718 = vpow2.f32 %v401_v16 }
  0x9d   : > { %v391_v19 = vrot.slane %v384_v17, %v1094_v8  ;;  %720 = vpow2.f32 %v403_v18 }
  0x9f   : > { %v393_v21 = vsel %vm1100_vm3, %v391_v19, 0.0 }
  0xa0   : > { %398 = vst.msk [vmem:[%s252_s24] sm:$0x3] %vm1115_vm6, %v393_v21 }
  0xa1   : > { %795 = shalt.err (!%p792_p2)
}
  0xa2   : > { %s796_s10 = scalar_lea.hbm %s1126_s18, 32  ;;  %s800_s22 = scalar_lea.hbm %s1217_s2, 64 }
  0xa3   : > { %p797_p9 = scmp.ne.s32.totalorder %s1126_s18, %s796_s10  ;;  %p801_p6 = scmp.lt.u32.totalorder %s1126_s18, %s1217_s2 }
  0xa4   : > { %p802_p13 = scmp.lt.u32.totalorder %s800_s22, %s796_s10  ;;  %p804_p8 = scmp.lt.u32.totalorder %s796_s10, %s1126_s18 }
  0xa5   : > { %p798_p11 = pnand %p797_p9, %p1235_p0 }
  0xa6   : > { %p803_p5 = por %p802_p13, %p801_p6 }
  0xa7   : > { %p799_p3 = pneg %p798_p11 }
  0xa8   : > { %p805_p7 = por %p804_p8, %p803_p5 }
  0xaa   : > { %p806_p4 = pnand %p805_p7, %p799_p3 }
  0xac   : > { %809 = shalt.err (!%p806_p4)
}
  0xad   : > { %641 = dma.vmem_to_hbm [thread:$0]  (%p1235_p0), %s1119_s29, 32, %s1126_s18, %s428_s28   ;;  %v719_v0 = vpop.eup %718 }
  0xae   : > { %v405_v22 = vmin.f32 %v719_v0, 1.0  ;;  %v721_v23 = vpop.eup %720  ;;  %s259_s5 = scalar_lea.vmem [#allocation8], %s1085_s9  ;;  %s1164_s29 = scalar_lea.hbm %s1218_s3, %s635_s6 }
  0xaf   : > { %v406_v24 = vmin.f32 %v721_v23, 1.0  ;;  %s465_s11 = sshll.u32 %s259_s5, 4  ;;  %s433_s9 = scalar_lea.sflag [#allocation9], %s1076_s23  ;;  %s1157_s11 = int_to_ptr.vmem [resolvable:$true] %s465_s11 }
  0xb0   : > { %s810_s18 = scalar_lea.vmem %s1157_s11, 32  ;;  %s907_s15 = smov [#allocation8]  }
  0xb1   : > { %v409_v25 = vcombine.low %v405_v22, %v406_v24  ;;  %p811_p10 = scmp.ne.s32.totalorder %s1157_s11, %s810_s18  ;;  %s814_s28 = sshll.u32 %s907_s15, 4  ;;  %s815_s28 = int_to_ptr.vmem [resolvable:$false] %s814_s28 }
  0xb2   : > { %s816_s8 = scalar_lea.vmem %s815_s28, 64  ;;  %p817_p2 = scmp.lt.s32.totalorder %s1157_s11, %s815_s28 }
  0xb3   : > { %v416_v26 = vrot.slane %v409_v25, %v1094_v8  ;;  %p812_p12 = pnand %p811_p10, %p1235_p0  ;;  %p818_p9 = scmp.lt.s32.totalorder %s816_s8, %s810_s18 }
  0xb5   : > { %v423_v28 = vrot.slane %v416_v26, %v1094_v8  ;;  %p813_p1 = pneg %p812_p12  ;;  %p819_p11 = por %p818_p9, %p817_p2 }
  0xb7   : > { %v425_v29 = vsel %vm1100_vm3, %v423_v28, 2.0  ;;  %p820_p3 = pnand %p819_p11, %p813_p1 }
  0xb8   : > { %426 = vst.msk [vmem:[%s259_s5] sm:$0x3] %vm1115_vm6, %v425_v29 }
  0xb9   : > { %823 = shalt.err (!%p820_p3)
}
  0xba   : > { %s824_s23 = scalar_lea.hbm %s1164_s29, 32  ;;  %s828_s30 = scalar_lea.hbm %s1218_s3, 64 }
  0xbb   : > { %p825_p6 = scmp.ne.s32.totalorder %s1164_s29, %s824_s23  ;;  %p829_p8 = scmp.lt.u32.totalorder %s1164_s29, %s1218_s3 }
  0xbc   : > { %p830_p7 = scmp.lt.u32.totalorder %s828_s30, %s824_s23  ;;  %p832_p10 = scmp.lt.u32.totalorder %s824_s23, %s1164_s29 }
  0xbd   : > { %p826_p13 = pnand %p825_p6, %p1235_p0 }
  0xbe   : > { %p831_p4 = por %p830_p7, %p829_p8 }
  0xbf   : > { %p827_p5 = pneg %p826_p13 }
  0xc0   : > { %p833_p12 = por %p832_p10, %p831_p4 }
  0xc2   : > { %p834_p1 = pnand %p833_p12, %p827_p5 }
  0xc4   : > { %837 = shalt.err (!%p834_p1)
}
  0xc5   : > { %642 = dma.vmem_to_hbm [thread:$0]  (%p1235_p0), %s1157_s11, 32, %s1164_s29, %s433_s9  }
  0xc6 PF: > { %s477_s24 = sand.u32 1, %s880_s12   ;;  %p1236_p2 = scmp.ne.s32.totalorder %s1224_s27, 0 }
  0xc7   : > { %p1237_p9 = scmp.ge.s32.totalorder %s900_s17, 2  ;;  %s478_s4 = scalar_lea.sflag [#allocation4], %s477_s24 }
  0xc9   : > { %p653_p11 = pnand %p1237_p9, %p1236_p2 }
  0xcb   : > { %871 = dma.done.wait (!%p653_p11), %s478_s4, 32  }
  0xcc   : > { %873 = vsyncadd (!%p653_p11), %s478_s4, 4294967264  ;;  %s487_s5 = scalar_lea.sflag [#allocation9], %s477_s24 }
  0xcd   : > { %875 = dma.done.wait (!%p653_p11), %s487_s5, 32  }
  0xce   : > { %877 = vsyncadd (!%p653_p11), %s487_s5, 4294967264  ;;  %s26_s17 = sadd.s32 1, %s900_s17   ;;  %s1238_s12 = smov %s884_s13 }
  0xcf   : > { %p23_p3 = scmp.ge.s32.totalorder %s26_s17, 4   ;;  %s1239_s13 = smov %s888_s14 }
  0xd0   : > { %s1240_s14 = smov %s984_s26  ;;  %s1241_s15 = smov %s896_s16 }
  0xd1   : > { %s1242_s16 = smov %s1244_s20  ;;  %25 = sbr.rel (!%p23_p3) target bundleno = 10 (0xa), region = 103 }
  0xd8   :  { %492 = vsyncpa [#allocation3], 1 }
  0xd9   :  { %494 = vsyncpa [#allocation3 + $0x1], 1 }
  0xda   :  { %495 = vsyncpa [#allocation6], 1 }
  0xdb   :  { %497 = vsyncpa [#allocation6 + $0x1], 1 }
  0xdc   :  { %498 = vsyncpa [#allocation4], 1 }
  0xdd   :  { %500 = vsyncpa [#allocation4 + $0x1], 1 }
  0xde   :  { %501 = vsyncpa [#allocation9], 1 }
  0xdf   :  { %503 = vsyncpa [#allocation9 + $0x1], 1 }

</bundles_post_ra>
